<compile_context>
chip_gen: v5e
topology: v5e:2x2
jax: 0.10.0
libtpu: 0.0.40
codegen_flags: <defaults>
</compile_context>

<pallas_src>
import jax
import jax.numpy as jnp
from jax.experimental import pallas as pl
from jax.experimental.pallas import tpu as pltpu

F_IN = 784            # input / output feature dim of the autoencoder
H1 = 64               # hidden width
CODE = 20             # bottleneck width
DEFAULT_BLOCK_B = 1024  # batch-tile cap; ~20 MB double-buffered working set,
                        # fits under the raised 48 MiB scoped-VMEM limit on
                        # v5e/v6e and leaves headroom on v7x (64 MiB physical).
VMEM_LIMIT_BYTES = 48 << 20


def _round_up(n, m):
    return ((n + m - 1) // m) * m


def _choose_tiling(batch, block_b):
    """Balanced batch tiling: tb multiple of 8, minimal padding, >=2 tiles when
    possible so a v7x megacore can split the parallel axis across both TCs."""
    min_tiles = 2 if batch >= 16 else 1
    nt = max(pl.cdiv(batch, block_b), min_tiles)
    nt = min(nt, pl.cdiv(batch, 8))          # never shrink tiles below 8 rows
    tb = _round_up(pl.cdiv(batch, nt), 8)
    nt = pl.cdiv(batch, tb)
    return tb, nt


def autoencoder_kernel(x_ref,
                       w1_ref, b1_ref,
                       w2_ref, b2_ref,
                       w3_ref, b3_ref,
                       w4_ref, b4_ref,
                       enc_ref, dec_ref):
    # x arrives as f32 (no wrapper pad/cast); cast to bf16 for the MXU here.
    x = x_ref[...].astype(jnp.bfloat16)                              # (TB, 784)

    # ----- encoder -----
    h1 = jnp.dot(x, w1_ref[...], preferred_element_type=jnp.float32) + b1_ref[...]
    h1 = jnp.maximum(h1, 0.0)                                        # ReLU
    # 64x20 matmul in f32: <2% of FLOPs, MXU is idle (mem-bound), and it keeps
    # the returned `encoded` bit-identical to what the decoder consumes.
    enc = jnp.dot(h1, w2_ref[...], preferred_element_type=jnp.float32) + b2_ref[...]

    # ----- decoder -----
    h2 = jnp.dot(enc, w3_ref[...], preferred_element_type=jnp.float32) + b3_ref[...]
    h2 = jnp.maximum(h2, 0.0)                                        # ReLU
    dec = jnp.dot(h2.astype(jnp.bfloat16), w4_ref[...],
                  preferred_element_type=jnp.float32) + b4_ref[...]  # (TB, 784)

    enc_ref[...] = enc.astype(enc_ref.dtype)
    dec_ref[...] = dec.astype(dec_ref.dtype)


def autoencoder_forward(x, params, *, block_b=DEFAULT_BLOCK_B):
    """x: (B, 784) float32.  params: (in, out)-layout weights + (1, out) biases.

    Returns (encoded (B, 20) f32, decoded (B, 784) f32).
    """
    B = x.shape[0]
    assert x.shape[1] == F_IN

    tb, num_tiles = _choose_tiling(B, block_b)
    b_pad = num_tiles * tb

    # Only touch x if the batch needs rounding up to a whole number of tiles.
    x_in = x if b_pad == B else jnp.zeros((b_pad, F_IN), x.dtype).at[:B].set(x)

    # Big-matmul weights in bf16 (MXU-native); tiny-layer weights & all biases
    # stay f32.  (In production these casts would be done once at load time.)
    w1 = params["w1"].astype(jnp.bfloat16)          # (784, 64)
    b1 = params["b1"].astype(jnp.float32)           # (1, 64)
    w2 = params["w2"].astype(jnp.float32)           # (64, 20)
    b2 = params["b2"].astype(jnp.float32)           # (1, 20)
    w3 = params["w3"].astype(jnp.float32)           # (20, 64)
    b3 = params["b3"].astype(jnp.float32)           # (1, 64)
    w4 = params["w4"].astype(jnp.bfloat16)          # (64, 784)
    b4 = params["b4"].astype(jnp.float32)           # (1, 784)

    def resident(shape):
        # Full-extent block, constant index map: DMA'd once, VMEM-resident.
        return pl.BlockSpec(shape, lambda i, _s=shape: (0,) * len(_s))

    enc, dec = pl.pallas_call(
        autoencoder_kernel,
        out_shape=(
            jax.ShapeDtypeStruct((b_pad, CODE), jnp.float32),   # encoded
            jax.ShapeDtypeStruct((b_pad, F_IN), jnp.float32),   # decoded (true 784 width)
        ),
        grid=(num_tiles,),
        in_specs=[
            pl.BlockSpec((tb, F_IN), lambda i: (i, 0)),         # x: batch-tiled, f32
            resident(w1.shape), resident(b1.shape),
            resident(w2.shape), resident(b2.shape),
            resident(w3.shape), resident(b3.shape),
            resident(w4.shape), resident(b4.shape),
        ],
        out_specs=(
            pl.BlockSpec((tb, CODE), lambda i: (i, 0)),
            pl.BlockSpec((tb, F_IN), lambda i: (i, 0)),
        ),
        compiler_params=pltpu.CompilerParams(
            dimension_semantics=("parallel",),                  # megacore on v7x
            vmem_limit_bytes=VMEM_LIMIT_BYTES,
        ),
    )(x_in, w1, b1, w2, b2, w3, b3, w4, b4)

    if b_pad != B:
        enc, dec = enc[:B], dec[:B]
    return enc, dec


def init_params(key):
    """Deterministic init mirroring nn.Linear; weights stored (in, out), f32."""
    ks = jax.random.split(key, 8)

    def linear(kw, kb, fan_in, fan_out):
        bound = 1.0 / jnp.sqrt(fan_in)
        w = jax.random.uniform(kw, (fan_in, fan_out), jnp.float32, -bound, bound)
        b = jax.random.uniform(kb, (1, fan_out), jnp.float32, -bound, bound)
        return w, b

    w1, b1 = linear(ks[0], ks[1], 784, 64)
    w2, b2 = linear(ks[2], ks[3], 64, 20)
    w3, b3 = linear(ks[4], ks[5], 20, 64)
    w4, b4 = linear(ks[6], ks[7], 64, 784)
    return dict(w1=w1, b1=b1, w2=w2, b2=b2, w3=w3, b3=b3, w4=w4, b4=b4)


def reference_forward(x, p):
    """Pure-f32 reference with PyTorch forward semantics."""
    h1 = jnp.maximum(x @ p["w1"] + p["b1"], 0.0)
    enc = h1 @ p["w2"] + p["b2"]
    h2 = jnp.maximum(enc @ p["w3"] + p["b3"], 0.0)
    dec = h2 @ p["w4"] + p["b4"]
    return enc, dec


if __name__ == "__main__":
    key = jax.random.PRNGKey(0)
    k_params, k_x = jax.random.split(key)

    params = init_params(k_params)
    # NOTE: B=8 is a correctness smoke test; the tiling / bf16 / megacore wins
    # only show up at batch sizes in the hundreds-to-thousands.
    B = 8
    x = jax.random.normal(k_x, (B, 784), jnp.float32)

    enc, dec = autoencoder_forward(x, params)
    enc, dec = jax.block_until_ready(enc), jax.block_until_ready(dec)

    enc_ref, dec_ref = reference_forward(x, params)
    assert enc.shape == (B, 20) and dec.shape == (B, 784)
    # bf16 operands on the 784-dim matmuls (f32 accumulation) => loosened
    # tolerances vs the pure-f32 reference; intentional (documented) tradeoff.
    assert jnp.allclose(enc, enc_ref, atol=5e-2, rtol=5e-2)
    assert jnp.allclose(dec, dec_ref, atol=5e-2, rtol=5e-2)

    print("KERNEL_OK")
</pallas_src>

<mosaic_0001>
module attributes {stable_mosaic.version = 11 : i64} {
  func.func @autoencoder_kernel(%arg0: i32, %arg1: memref<8x784xf32, #tpu.memory_space<vmem>>, %arg2: memref<784x64xbf16, #tpu.memory_space<vmem>>, %arg3: memref<1x64xf32, #tpu.memory_space<vmem>>, %arg4: memref<64x20xf32, #tpu.memory_space<vmem>>, %arg5: memref<1x20xf32, #tpu.memory_space<vmem>>, %arg6: memref<20x64xf32, #tpu.memory_space<vmem>>, %arg7: memref<1x64xf32, #tpu.memory_space<vmem>>, %arg8: memref<64x784xbf16, #tpu.memory_space<vmem>>, %arg9: memref<1x784xf32, #tpu.memory_space<vmem>>, %arg10: memref<8x20xf32, #tpu.memory_space<vmem>>, %arg11: memref<8x784xf32, #tpu.memory_space<vmem>>) attributes {dimension_semantics = [#tpu.dimension_semantics<parallel>], iteration_bounds = array<i64: 1>, scalar_prefetch = 0 : i64, scratch_operands = 0 : i64, tpu.core_type = #tpu.core_type<tc>, window_params = [{transform_indices = @transform_0, window_bounds = array<i64: 8, 784>}, {pipeline_mode = #tpu.pipeline_mode<synchronous>, transform_indices = @transform_1, window_bounds = array<i64: 784, 64>}, {pipeline_mode = #tpu.pipeline_mode<synchronous>, transform_indices = @transform_2, window_bounds = array<i64: 1, 64>}, {pipeline_mode = #tpu.pipeline_mode<synchronous>, transform_indices = @transform_3, window_bounds = array<i64: 64, 20>}, {pipeline_mode = #tpu.pipeline_mode<synchronous>, transform_indices = @transform_4, window_bounds = array<i64: 1, 20>}, {pipeline_mode = #tpu.pipeline_mode<synchronous>, transform_indices = @transform_5, window_bounds = array<i64: 20, 64>}, {pipeline_mode = #tpu.pipeline_mode<synchronous>, transform_indices = @transform_6, window_bounds = array<i64: 1, 64>}, {pipeline_mode = #tpu.pipeline_mode<synchronous>, transform_indices = @transform_7, window_bounds = array<i64: 64, 784>}, {pipeline_mode = #tpu.pipeline_mode<synchronous>, transform_indices = @transform_8, window_bounds = array<i64: 1, 784>}, {transform_indices = @transform_9, window_bounds = array<i64: 8, 20>}, {transform_indices = @transform_10, window_bounds = array<i64: 8, 784>}]} {
    %c0 = arith.constant 0 : index
    %c0_0 = arith.constant 0 : index
    %0 = vector.load %arg1[%c0, %c0_0] : memref<8x784xf32, #tpu.memory_space<vmem>>, vector<8x784xf32>
    %1 = arith.truncf %0 : vector<8x784xf32> to vector<8x784xbf16>
    %c0_1 = arith.constant 0 : index
    %c0_2 = arith.constant 0 : index
    %2 = vector.load %arg2[%c0_1, %c0_2] : memref<784x64xbf16, #tpu.memory_space<vmem>>, vector<784x64xbf16>
    %cst = arith.constant dense<0.000000e+00> : vector<8x64xf32>
    %3 = tpu.matmul %1, %2, %cst {dimension_numbers = #tpu.dot_dimension_numbers<[1], [0], [0], [1], [0, 0, 1, 1], [], []>} : vector<8x784xbf16>, vector<784x64xbf16>, vector<8x64xf32> -> vector<8x64xf32>
    %c0_3 = arith.constant 0 : index
    %c0_4 = arith.constant 0 : index
    %4 = vector.load %arg3[%c0_3, %c0_4] : memref<1x64xf32, #tpu.memory_space<vmem>>, vector<1x64xf32>
    %5 = vector.broadcast %4 : vector<1x64xf32> to vector<8x64xf32>
    %6 = arith.addf %3, %5 : vector<8x64xf32>
    %cst_5 = arith.constant 0.000000e+00 : f32
    %7 = vector.broadcast %cst_5 : f32 to vector<8x64xf32>
    %8 = arith.maximumf %6, %7 : vector<8x64xf32>
    %c0_6 = arith.constant 0 : index
    %c0_7 = arith.constant 0 : index
    %9 = vector.load %arg4[%c0_6, %c0_7] : memref<64x20xf32, #tpu.memory_space<vmem>>, vector<64x20xf32>
    %cst_8 = arith.constant dense<0.000000e+00> : vector<8x20xf32>
    %10 = tpu.matmul %8, %9, %cst_8 {dimension_numbers = #tpu.dot_dimension_numbers<[1], [0], [0], [1], [0, 0, 1, 1], [], []>} : vector<8x64xf32>, vector<64x20xf32>, vector<8x20xf32> -> vector<8x20xf32>
    %c0_9 = arith.constant 0 : index
    %c0_10 = arith.constant 0 : index
    %11 = vector.load %arg5[%c0_9, %c0_10] : memref<1x20xf32, #tpu.memory_space<vmem>>, vector<1x20xf32>
    %12 = vector.broadcast %11 : vector<1x20xf32> to vector<8x20xf32>
    %13 = arith.addf %10, %12 : vector<8x20xf32>
    %c0_11 = arith.constant 0 : index
    %c0_12 = arith.constant 0 : index
    %14 = vector.load %arg6[%c0_11, %c0_12] : memref<20x64xf32, #tpu.memory_space<vmem>>, vector<20x64xf32>
    %cst_13 = arith.constant dense<0.000000e+00> : vector<8x64xf32>
    %15 = tpu.matmul %13, %14, %cst_13 {dimension_numbers = #tpu.dot_dimension_numbers<[1], [0], [0], [1], [0, 0, 1, 1], [], []>} : vector<8x20xf32>, vector<20x64xf32>, vector<8x64xf32> -> vector<8x64xf32>
    %c0_14 = arith.constant 0 : index
    %c0_15 = arith.constant 0 : index
    %16 = vector.load %arg7[%c0_14, %c0_15] : memref<1x64xf32, #tpu.memory_space<vmem>>, vector<1x64xf32>
    %17 = vector.broadcast %16 : vector<1x64xf32> to vector<8x64xf32>
    %18 = arith.addf %15, %17 : vector<8x64xf32>
    %cst_16 = arith.constant 0.000000e+00 : f32
    %19 = vector.broadcast %cst_16 : f32 to vector<8x64xf32>
    %20 = arith.maximumf %18, %19 : vector<8x64xf32>
    %21 = arith.truncf %20 : vector<8x64xf32> to vector<8x64xbf16>
    %c0_17 = arith.constant 0 : index
    %c0_18 = arith.constant 0 : index
    %22 = vector.load %arg8[%c0_17, %c0_18] : memref<64x784xbf16, #tpu.memory_space<vmem>>, vector<64x784xbf16>
    %cst_19 = arith.constant dense<0.000000e+00> : vector<8x784xf32>
    %23 = tpu.matmul %21, %22, %cst_19 {dimension_numbers = #tpu.dot_dimension_numbers<[1], [0], [0], [1], [0, 0, 1, 1], [], []>} : vector<8x64xbf16>, vector<64x784xbf16>, vector<8x784xf32> -> vector<8x784xf32>
    %c0_20 = arith.constant 0 : index
    %c0_21 = arith.constant 0 : index
    %24 = vector.load %arg9[%c0_20, %c0_21] : memref<1x784xf32, #tpu.memory_space<vmem>>, vector<1x784xf32>
    %25 = vector.broadcast %24 : vector<1x784xf32> to vector<8x784xf32>
    %26 = arith.addf %23, %25 : vector<8x784xf32>
    %c0_22 = arith.constant 0 : index
    %c0_23 = arith.constant 0 : index
    %27 = vector.load %arg10[%c0_22, %c0_23] : memref<8x20xf32, #tpu.memory_space<vmem>>, vector<8x20xf32>
    tpu.vector_store %arg10[%c0_22, %c0_23], %13 {strides = array<i32>} : memref<8x20xf32, #tpu.memory_space<vmem>>, vector<8x20xf32>,
    %c0_24 = arith.constant 0 : index
    %c0_25 = arith.constant 0 : index
    %28 = vector.load %arg11[%c0_24, %c0_25] : memref<8x784xf32, #tpu.memory_space<vmem>>, vector<8x784xf32>
    tpu.vector_store %arg11[%c0_24, %c0_25], %26 {strides = array<i32>} : memref<8x784xf32, #tpu.memory_space<vmem>>, vector<8x784xf32>,
    return
  }
  func.func @transform_0(%arg0: i32) -> (i32, i32) {
    %c0_i32 = arith.constant 0 : i32
    %c0_i32_0 = arith.constant 0 : i32
    return %arg0, %c0_i32 : i32, i32
  }
  func.func @transform_1(%arg0: i32) -> (i32, i32) {
    %c0_i32 = arith.constant 0 : i32
    %c0_i32_0 = arith.constant 0 : i32
    %c0_i32_1 = arith.constant 0 : i32
    return %c0_i32, %c0_i32_0 : i32, i32
  }
  func.func @transform_2(%arg0: i32) -> (i32, i32) {
    %c0_i32 = arith.constant 0 : i32
    %c0_i32_0 = arith.constant 0 : i32
    %c0_i32_1 = arith.constant 0 : i32
    return %c0_i32, %c0_i32_0 : i32, i32
  }
  func.func @transform_3(%arg0: i32) -> (i32, i32) {
    %c0_i32 = arith.constant 0 : i32
    %c0_i32_0 = arith.constant 0 : i32
    %c0_i32_1 = arith.constant 0 : i32
    return %c0_i32, %c0_i32_0 : i32, i32
  }
  func.func @transform_4(%arg0: i32) -> (i32, i32) {
    %c0_i32 = arith.constant 0 : i32
    %c0_i32_0 = arith.constant 0 : i32
    %c0_i32_1 = arith.constant 0 : i32
    return %c0_i32, %c0_i32_0 : i32, i32
  }
  func.func @transform_5(%arg0: i32) -> (i32, i32) {
    %c0_i32 = arith.constant 0 : i32
    %c0_i32_0 = arith.constant 0 : i32
    %c0_i32_1 = arith.constant 0 : i32
    return %c0_i32, %c0_i32_0 : i32, i32
  }
  func.func @transform_6(%arg0: i32) -> (i32, i32) {
    %c0_i32 = arith.constant 0 : i32
    %c0_i32_0 = arith.constant 0 : i32
    %c0_i32_1 = arith.constant 0 : i32
    return %c0_i32, %c0_i32_0 : i32, i32
  }
  func.func @transform_7(%arg0: i32) -> (i32, i32) {
    %c0_i32 = arith.constant 0 : i32
    %c0_i32_0 = arith.constant 0 : i32
    %c0_i32_1 = arith.constant 0 : i32
    return %c0_i32, %c0_i32_0 : i32, i32
  }
  func.func @transform_8(%arg0: i32) -> (i32, i32) {
    %c0_i32 = arith.constant 0 : i32
    %c0_i32_0 = arith.constant 0 : i32
    %c0_i32_1 = arith.constant 0 : i32
    return %c0_i32, %c0_i32_0 : i32, i32
  }
  func.func @transform_9(%arg0: i32) -> (i32, i32) {
    %c0_i32 = arith.constant 0 : i32
    %c0_i32_0 = arith.constant 0 : i32
    return %arg0, %c0_i32 : i32, i32
  }
  func.func @transform_10(%arg0: i32) -> (i32, i32) {
    %c0_i32 = arith.constant 0 : i32
    %c0_i32_0 = arith.constant 0 : i32
    return %arg0, %c0_i32 : i32, i32
  }
}

</mosaic_0001>

<bundles_post_ra>
// kernel: tpu_custom_call.1
= control target key start
LH: loop header
LB: loop body
LE: loop exit
PB: predicated region body
PF: predicated region fallthrough
CT: control target
= control target key end

     0   :  { %16 = vsyncpa [#allocation3], 0  ;;  %s1849_s0 = inlined_call_operand.vmem [shape: f32[8,784], index: 0, kind: input, shape index: {}]   ;;  %s1850_s1 = inlined_call_operand.vmem [shape: bf16[784,64], index: 1, kind: input, shape index: {}]   ;;  %s1851_s2 = inlined_call_operand.vmem [shape: f32[1,64], index: 2, kind: input, shape index: {}]   ;;  %s1852_s3 = inlined_call_operand.vmem [shape: f32[64,20], index: 3, kind: input, shape index: {}]   ;;  %s1853_s4 = inlined_call_operand.vmem [shape: f32[1,20], index: 4, kind: input, shape index: {}]   ;;  %s1854_s5 = inlined_call_operand.vmem [shape: f32[20,64], index: 5, kind: input, shape index: {}]   ;;  %s1855_s6 = inlined_call_operand.vmem [shape: f32[1,64], index: 6, kind: input, shape index: {}]   ;;  %s1856_s7 = inlined_call_operand.vmem [shape: bf16[64,784], index: 7, kind: input, shape index: {}]   ;;  %s1857_s8 = inlined_call_operand.vmem [shape: f32[1,784], index: 8, kind: input, shape index: {}]   ;;  %s1858_s9 = inlined_call_operand.hbm [shape: f32[8,20], index: 9, kind: output, shape index: {0}]   ;;  %s1859_s10 = inlined_call_operand.hbm [shape: f32[8,784], index: 10, kind: output, shape index: {1}]  }
   0x1   :  { %v1268_v0 = vld [vmem:[%s1850_s1 + $0x38] sm:$0xff]  ;;  %v1267_v3 = vld [vmem:[%s1850_s1 + $0x30] sm:$0xff]  ;;  %v1266_v8 = vld [vmem:[%s1850_s1 + $0x28] sm:$0xff] }
   0x2   :  { %v1276_v1 = vld [vmem:[%s1850_s1 + $0x78] sm:$0xff]  ;;  %451 = vmatpush.bf16.msra.mxu0 %v1268_v0  ;;  %v1275_v4 = vld [vmem:[%s1850_s1 + $0x70] sm:$0xff]  ;;  %v1274_v9 = vld [vmem:[%s1850_s1 + $0x68] sm:$0xff] }
   0x3   :  { %v1284_v2 = vld [vmem:[%s1850_s1 + $0xb8] sm:$0xff]  ;;  %464 = vmatpush.bf16.msra.mxu1 %v1276_v1  ;;  %v1283_v5 = vld [vmem:[%s1850_s1 + $0xb0] sm:$0xff]  ;;  %v1282_v10 = vld [vmem:[%s1850_s1 + $0xa8] sm:$0xff] }
   0x4   :  { %477 = vmatpush.bf16.msra.mxu2 %v1284_v2  ;;  %v1292_v6 = vld [vmem:[%s1850_s1 + $0xf8] sm:$0xff]  ;;  %v1291_v7 = vld [vmem:[%s1850_s1 + $0xf0] sm:$0xff]  ;;  %v1290_v11 = vld [vmem:[%s1850_s1 + $0xe8] sm:$0xff] }
   0x5   :  { %490 = vmatpush.bf16.msra.mxu3 %v1292_v6  ;;  %v1265_v12 = vld [vmem:[%s1850_s1 + $0x20] sm:$0xff]  ;;  %v1264_v16 = vld [vmem:[%s1850_s1 + $0x18] sm:$0xff] }
   0x6   :  { %452 = vmatpush.bf16.msra.mxu0 %v1267_v3  ;;  %v1273_v13 = vld [vmem:[%s1850_s1 + $0x60] sm:$0xff]  ;;  %v1272_v17 = vld [vmem:[%s1850_s1 + $0x58] sm:$0xff] }
   0x7   :  { %465 = vmatpush.bf16.msra.mxu1 %v1275_v4  ;;  %v1281_v14 = vld [vmem:[%s1850_s1 + $0xa0] sm:$0xff]  ;;  %v1280_v18 = vld [vmem:[%s1850_s1 + $0x98] sm:$0xff] }
   0x8   :  { %478 = vmatpush.bf16.msra.mxu2 %v1283_v5  ;;  %v1289_v15 = vld [vmem:[%s1850_s1 + $0xe0] sm:$0xff]  ;;  %v1288_v19 = vld [vmem:[%s1850_s1 + $0xd8] sm:$0xff] }
   0x9   :  { %491 = vmatpush.bf16.msra.mxu3 %v1291_v7 }
   0xa   :  { %453 = vmatpush.bf16.msra.mxu0 %v1266_v8 }
   0xb   :  { %466 = vmatpush.bf16.msra.mxu1 %v1274_v9 }
   0xc   :  { %479 = vmatpush.bf16.msra.mxu2 %v1282_v10 }
   0xd   :  { %492 = vmatpush.bf16.msra.mxu3 %v1290_v11 }
   0xe   :  { %454 = vmatpush.bf16.msra.mxu0 %v1265_v12 }
   0xf   :  { %467 = vmatpush.bf16.msra.mxu1 %v1273_v13 }
  0x10   :  { %480 = vmatpush.bf16.msra.mxu2 %v1281_v14 }
  0x11   :  { %493 = vmatpush.bf16.msra.mxu3 %v1289_v15 }
  0x12   :  { %17 = vsyncpa [#allocation5], 0  ;;  %455 = vmatpush.bf16.msra.mxu0 %v1264_v16  ;;  %v1263_v20 = vld [vmem:[%s1850_s1 + $0x10] sm:$0xff]  ;;  %v1262_v24 = vld [vmem:[%s1850_s1 + $0x8] sm:$0xff]  ;;  %vm447_vm0 = vcmask 130048   ;;  %vm590_vm1 = vcmask 1043456  }
  0x13   :  { %468 = vmatpush.bf16.msra.mxu1 %v1272_v17  ;;  %v1271_v21 = vld [vmem:[%s1850_s1 + $0x50] sm:$0xff]  ;;  %v1270_v25 = vld [vmem:[%s1850_s1 + $0x48] sm:$0xff]  ;;  %v1261_v27 = vld [vmem:[%s1850_s1] sm:$0xff]  ;;  %vm555_vm2 = vcmask 523264   ;;  %vm586_vm3 = vcmask 162816   ;;  %s917_s17 = sshll.u32 %s1858_s9, 4  ;;  %s918_s17 = int_to_ptr.hbm [resolvable:$true] %s917_s17 }
  0x14   :  { %481 = vmatpush.bf16.msra.mxu2 %v1280_v18  ;;  %v1279_v22 = vld [vmem:[%s1850_s1 + $0x90] sm:$0xff]  ;;  %v1278_v26 = vld [vmem:[%s1850_s1 + $0x88] sm:$0xff]  ;;  %v1269_v29 = vld [vmem:[%s1850_s1 + $0x40] sm:$0xff] }
  0x15   :  { %494 = vmatpush.bf16.msra.mxu3 %v1288_v19  ;;  %v1287_v23 = vld [vmem:[%s1850_s1 + $0xd0] sm:$0xff]  ;;  %v1286_v28 = vld [vmem:[%s1850_s1 + $0xc8] sm:$0xff]  ;;  %v37_v30 = vld [vmem:[%s1849_s0] sm:$0xff] }
  0x16   :  { %456 = vmatpush.bf16.msra.mxu0 %v1263_v20  ;;  %v38_v31 = vld [vmem:[%s1849_s0 + $0x8] sm:$0xff]  ;;  %v1300_v32 = vld [vmem:[%s1850_s1 + $0x138] sm:$0xff]  ;;  %v1277_v34 = vld [vmem:[%s1850_s1 + $0x80] sm:$0xff]  ;;  %v44_v36 = vpack.c.bf16 %v37_v30, %v37_v30 }
  0x17   :  { %469 = vmatpush.bf16.msra.mxu1 %v1271_v21  ;;  %v1308_v33 = vld [vmem:[%s1850_s1 + $0x178] sm:$0xff]  ;;  %v39_v35 = vld [vmem:[%s1849_s0 + $0x10] sm:$0xff]  ;;  %v45_v37 = vpack.c.bf16 %v38_v31, %v38_v31  ;;  %v1285_v38 = vld [vmem:[%s1850_s1 + $0xc0] sm:$0xff] }
  0x18   :  { %482 = vmatpush.bf16.msra.mxu2 %v1279_v22  ;;  %v1309_v39 = vld [vmem:[%s1850_s1 + $0x180] sm:$0xff]  ;;  %v40_v40 = vld [vmem:[%s1849_s0 + $0x18] sm:$0xff]  ;;  %v1299_v41 = vld [vmem:[%s1850_s1 + $0x130] sm:$0xff]  ;;  %v46_v43 = vpack.c.bf16 %v39_v35, %v39_v35 }
  0x19   :  { %495 = vmatpush.bf16.msra.mxu3 %v1287_v23  ;;  %v1307_v42 = vld [vmem:[%s1850_s1 + $0x170] sm:$0xff]  ;;  %v47_v44 = vpack.c.bf16 %v40_v40, %v40_v40  ;;  %v1298_v45 = vld [vmem:[%s1850_s1 + $0x128] sm:$0xff]  ;;  %v1297_v47 = vld [vmem:[%s1850_s1 + $0x120] sm:$0xff] }
  0x1a   :  { %457 = vmatpush.bf16.msra.mxu0 %v1262_v24  ;;  %v1306_v46 = vld [vmem:[%s1850_s1 + $0x168] sm:$0xff]  ;;  %v1305_v48 = vld [vmem:[%s1850_s1 + $0x160] sm:$0xff]  ;;  %v1296_v49 = vld [vmem:[%s1850_s1 + $0x118] sm:$0xff] }
  0x1b   :  { %470 = vmatpush.bf16.msra.mxu1 %v1270_v25  ;;  %v1304_v50 = vld [vmem:[%s1850_s1 + $0x158] sm:$0xff]  ;;  %v43_v51 = vld [vmem:[%s1849_s0 + $0x30] sm:$0xff]  ;;  %v1294_v55 = vld [vmem:[%s1850_s1 + $0x108] sm:$0xff] }
  0x1c   :  { %483 = vmatpush.bf16.msra.mxu2 %v1278_v26  ;;  %v1295_v52 = vld [vmem:[%s1850_s1 + $0x110] sm:$0xff]  ;;  %v50_v54 = vpack.c.bf16 %v43_v51, %v43_v51  ;;  %v1302_v56 = vld [vmem:[%s1850_s1 + $0x148] sm:$0xff]  ;;  %v1293_v57 = vld [vmem:[%s1850_s1 + $0x100] sm:$0xff] }
  0x1d   :  { %496 = vmatpush.bf16.msra.mxu3 %v1286_v28  ;;  %v1303_v53 = vld [vmem:[%s1850_s1 + $0x150] sm:$0xff]  ;;  %v1301_v58 = vld [vmem:[%s1850_s1 + $0x140] sm:$0xff]  ;;  %v42_v60 = vld [vmem:[%s1849_s0 + $0x28] sm:$0xff] }
  0x1e   :  { %458 = vmatpush.bf16.msra.mxu0 %v1261_v27  ;;  %v41_v59 = vld [vmem:[%s1849_s0 + $0x20] sm:$0xff]  ;;  %v49_v62 = vpack.c.bf16 %v42_v60, %v42_v60  ;;  %v550_v63 = vld [vmem:[%s1852_s3 + $0x38] sm:$0xff]  ;;  %v549_v0 = vld [vmem:[%s1852_s3 + $0x30] sm:$0xff] }
  0x1f   :  { %471 = vmatpush.bf16.msra.mxu1 %v1269_v29  ;;  %v48_v61 = vpack.c.bf16 %v41_v59, %v41_v59  ;;  %v548_v1 = vld [vmem:[%s1852_s3 + $0x28] sm:$0xff]  ;;  %v547_v2 = vld [vmem:[%s1852_s3 + $0x20] sm:$0xff]  ;;  %v546_v3 = vld [vmem:[%s1852_s3 + $0x18] sm:$0xff] }
  0x20   :  { %484 = vmatpush.bf16.msra.mxu2 %v1277_v34  ;;  %v545_v6 = vld [vmem:[%s1852_s3 + $0x10] sm:$0xff]  ;;  %v544_v7 = vld [vmem:[%s1852_s3 + $0x8] sm:$0xff]  ;;  %v543_v8 = vld [vmem:[%s1852_s3] sm:$0xff] }
  0x21   :  { %459 = vmatmul.bf16.vlgmr.msra.gmra.mxu0 %v44_v36  ;;  %497 = vmatpush.bf16.msra.mxu3 %v1285_v38  ;;  %v581_v9 = vld [vmem:[%s1854_s5 + $0x10] sm:$0xf]  ;;  %v580_v10 = vld [vmem:[%s1854_s5 + $0x8] sm:$0xff]  ;;  %v1340_v15 = vld [vmem:[%s1851_s2] ss:$0 sm:$0xff] }
  0x22   :  { %503 = vmatpush.bf16.msrb.mxu0 %v1300_v32  ;;  %472 = vmatmul.bf16.vlgmr.msra.gmra.mxu1 %v45_v37  ;;  %v579_v32 = vld [vmem:[%s1854_s5] sm:$0xff]  ;;  %v1331_v35 = vld [vmem:[%s1856_s7 + $0xac] sm:$0xf]  ;;  %v1230_v37 = vld [vmem:[%s1856_s7 + $0xc4] sm:$0xf0] }
  0x23   :  { %516 = vmatpush.bf16.msrb.mxu1 %v1308_v33  ;;  %485 = vmatmul.bf16.vlgmr.msra.gmra.mxu2 %v46_v43  ;;  %v1228_v33 = vld [vmem:[%s1856_s7 + $0xa8] sm:$0xf]  ;;  %v1334_v34 = vld [vmem:[%s1856_s7 + $0xc0] sm:$0xf0]  ;;  %v1236_v38 = vld [vmem:[%s1856_s7 + $0xb0] sm:$0xf]  ;;  %v1233_v40 = vor.u32 %v1331_v35, %v1230_v37 }
  0x24   :  { %536 = vmatpush.bf16.msrb.mxu2 %v1309_v39  ;;  %498 = vmatmul.bf16.vlgmr.msra.gmra.mxu3 %v47_v44  ;;  %v1229_v36 = vor.u32 %v1334_v34, %v1228_v33  ;;  %v1335_v39 = vld [vmem:[%s1856_s7 + $0xc8] sm:$0xf0]  ;;  %v1238_v43 = vld [vmem:[%s1856_s7 + $0xcc] sm:$0xf0]  ;;  %v1208_v51 = vld [vmem:[%s1856_s7 + $0x78] sm:$0xf] }
  0x25   :  { %567 = vmatpush.msrb.mxu3 %v550_v63  ;;  %v1200_v44 = vld [vmem:[%s1856_s7 + $0x70] sm:$0xf]  ;;  %v1341_v60 = vld [vmem:[%s1853_s4] ss:$0 sm:$0xff]  ;;  %v1317_v63 = vld [vmem:[%s1856_s7 + $0x3c] sm:$0xf] }
  0x26   :  { %504 = vmatpush.bf16.msrb.mxu0 %v1299_v41  ;;  %v1237_v41 = vor.u32 %v1335_v39, %v1236_v38  ;;  %v1218_v33 = vld [vmem:[%s1856_s7 + $0x9c] sm:$0xf0]  ;;  %v1224_v34 = vld [vmem:[%s1856_s7 + $0x88] sm:$0xf]  ;;  %v1330_v35 = vld [vmem:[%s1856_s7 + $0xa0] sm:$0xf0] }
  0x27   :  { %517 = vmatpush.bf16.msrb.mxu1 %v1307_v42  ;;  %568 = vmatpush.msrb.mxu3 %v549_v0  ;;  %v1332_v42 = vld [vmem:[%s1856_s7 + $0xb4] sm:$0xf]  ;;  %v1174_v0 = vld [vmem:[%s1856_s7 + $0x54] sm:$0xf0]  ;;  %v1225_v37 = vor.u32 %v1330_v35, %v1224_v34  ;;  %v1188_v38 = vld [vmem:[%s1856_s7 + $0x48] sm:$0xf] }
  0x28   :  { %815 = vmatpush.bf16.msra.mxu2 %v1229_v36  ;;  %v1322_v39 = vld [vmem:[%s1856_s7 + $0x60] sm:$0xf0]  ;;  %s928_s4 = sshll.u32 %s1859_s10, 4  ;;  %s929_s4 = int_to_ptr.hbm [resolvable:$true] %s928_s4 }
  0x29   :  { %569 = vmatpush.msrb.mxu3 %v548_v1  ;;  %v1180_v1 = vld [vmem:[%s1856_s7 + $0x40] sm:$0xf] }
  0x2a   :  { %505 = vmatpush.bf16.msrb.mxu0 %v1298_v45  ;;  %v1241_v45 = vor.u32 %v1332_v42, %v1238_v43  ;;  %v1196_v42 = vld [vmem:[%s1856_s7 + $0x50] sm:$0xf]  ;;  %v1323_v43 = vld [vmem:[%s1856_s7 + $0x68] sm:$0xf0] }
  0x2b   :  { %518 = vmatpush.bf16.msrb.mxu1 %v1306_v46  ;;  %570 = vmatpush.msrb.mxu3 %v547_v2  ;;  %v1327_v46 = vld [vmem:[%s1856_s7 + $0x88] sm:$0xf0]  ;;  %v1177_v2 = vor.u32 %v1317_v63, %v1174_v0 }
  0x2d   :  { %571 = vmatpush.msrb.mxu3 %v546_v3  ;;  %v1321_v3 = vld [vmem:[%s1856_s7 + $0x58] sm:$0xf0] }
  0x2e   :  { %506 = vmatpush.bf16.msrb.mxu0 %v1297_v47  ;;  %v1324_v47 = vld [vmem:[%s1856_s7 + $0x74] sm:$0xf] }
  0x2f   :  { %519 = vmatpush.bf16.msrb.mxu1 %v1305_v48  ;;  %572 = vmatpush.msrb.mxu3 %v545_v6  ;;  %v1202_v48 = vld [vmem:[%s1856_s7 + $0x8c] sm:$0xf0]  ;;  %v1181_v6 = vor.u32 %v1321_v3, %v1180_v1 }
  0x31   :  { %573 = vmatpush.msrb.mxu3 %v544_v7 }
  0x32   :  { %507 = vmatpush.bf16.msrb.mxu0 %v1296_v49  ;;  %v1201_v49 = vor.u32 %v1327_v46, %v1200_v44  ;;  %v1189_v44 = vor.u32 %v1322_v39, %v1188_v38  ;;  %v1197_v46 = vor.u32 %v1323_v43, %v1196_v42 }
  0x33   :  { %520 = vmatpush.bf16.msrb.mxu1 %v1304_v50  ;;  %1138 = vmatmul.msk.bf16.vlgmr.msrb.gmra.mxu2 %vm447_vm0, %v50_v54  ;;  %v1205_v50 = vor.u32 %v1324_v47, %v1202_v48  ;;  %v1160_v47 = vld [vmem:[%s1856_s7 + $0x10] sm:$0xf]  ;;  %v1315_v48 = vld [vmem:[%s1856_s7 + $0x28] sm:$0xf0] }
  0x34   :  { %574 = vmatpush.msrb.mxu3 %v543_v8  ;;  %816 = vmatpush.bf16.msra.mxu2 %v1201_v49  ;;  %v1144_v8 = vld [vmem:[%s1856_s7] sm:$0xf]  ;;  %v1312_v49 = vld [vmem:[%s1856_s7 + $0x14] sm:$0xf] }
  0x36   :  { %508 = vmatpush.bf16.msrb.mxu0 %v1295_v52  ;;  %1140 = vmatpush.msk.msra.mxu3 %vm590_vm1, %v581_v9  ;;  %v1328_v52 = vld [vmem:[%s1856_s7 + $0x90] sm:$0xf0]  ;;  %v1313_v9 = vld [vmem:[%s1856_s7 + $0x18] sm:$0xf0] }
  0x37   :  { %521 = vmatpush.bf16.msrb.mxu1 %v1303_v53  ;;  %v1325_v53 = vld [vmem:[%s1856_s7 + $0x7c] sm:$0xf]  ;;  %v1209_v54 = vor.u32 %v1328_v52, %v1208_v51  ;;  %v1168_v51 = vld [vmem:[%s1856_s7 + $0x18] sm:$0xf]  ;;  %v1316_v52 = vld [vmem:[%s1856_s7 + $0x30] sm:$0xf0] }
  0x38   :  { %608 = vmatpush.msra.mxu3 %v580_v10  ;;  %v1310_v10 = vld [vmem:[%s1856_s7 + $0x4] sm:$0xf] }
  0x3a   :  { %509 = vmatpush.bf16.msrb.mxu0 %v1294_v55  ;;  %609 = vmatpush.msra.mxu3 %v579_v32  ;;  %v1210_v55 = vld [vmem:[%s1856_s7 + $0x94] sm:$0xf0] }
  0x3b   :  { %522 = vmatpush.bf16.msrb.mxu1 %v1302_v56  ;;  %v1172_v56 = vld [vmem:[%s1856_s7 + $0x38] sm:$0xf] }
  0x3e   :  { %510 = vmatpush.bf16.msrb.mxu0 %v1293_v57  ;;  %v1320_v57 = vld [vmem:[%s1856_s7 + $0x50] sm:$0xf0] }
  0x3f   :  { %523 = vmatpush.bf16.msrb.mxu1 %v1301_v58  ;;  %v1213_v58 = vor.u32 %v1325_v53, %v1210_v55  ;;  %v1173_v59 = vor.u32 %v1320_v57, %v1172_v56  ;;  %v1161_v53 = vor.u32 %v1315_v48, %v1160_v47  ;;  %v1169_v55 = vor.u32 %v1316_v52, %v1168_v51  ;;  %v1342_v56 = vld [vmem:[%s1855_s6] ss:$0 sm:$0xff] }
  0x41   :  { %511 = vmatmul.bf16.vlgmr.msrb.gmra.mxu0 %v48_v61  ;;  %817 = vmatpush.bf16.msra.mxu2 %v1173_v59 }
  0x42   :  { %524 = vmatmul.bf16.vlgmr.msrb.gmra.mxu1 %v49_v62  ;;  %841 = vmatpush.bf16.msra.mxu0 %v1237_v41  ;;  %v1190_v41 = vld [vmem:[%s1856_s7 + $0x64] sm:$0xf0] }
  0x43   :  { %854 = vmatpush.bf16.msra.mxu1 %v1241_v45 }
  0x46   :  { %842 = vmatpush.bf16.msra.mxu0 %v1209_v54 }
  0x47   :  { %855 = vmatpush.bf16.msra.mxu1 %v1213_v58 }
  0x4a   :  { %843 = vmatpush.bf16.msra.mxu0 %v1181_v6 }
  0x9e   :  { %v460_v4 = vpop.f32.mrf.mxu0 }
  0x9f   :  { %v473_v5 = vpop.f32.mrf.mxu1  ;;  %v461_v16 = vadd.f32 %v1340_v15, %v460_v4  ;;  %v1318_v4 = vld [vmem:[%s1856_s7 + $0x44] sm:$0xf] }
  0xa1   :  { %v474_v19 = vadd.f32 %v473_v5, %v461_v16  ;;  %v1182_v5 = vld [vmem:[%s1856_s7 + $0x5c] sm:$0xf0] }
  0xa2   :  { %v1185_v7 = vor.u32 %v1318_v4, %v1182_v5 }
  0xa4   :  { %856 = vmatpush.bf16.msra.mxu1 %v1185_v7 }
  0xa6   :  { %v462_v11 = vpop.f32.mrf.mxu0  ;;  %v486_v13 = vpop.f32.mrf.mxu2 }
  0xa7   :  { %v475_v12 = vpop.f32.mrf.mxu1  ;;  %v499_v14 = vpop.f32.mrf.mxu3  ;;  %v487_v20 = vadd.f32 %v486_v13, %v474_v19  ;;  %v1145_v11 = vor.u32 %v1313_v9, %v1144_v8  ;;  %v1152_v13 = vld [vmem:[%s1856_s7 + $0x8] sm:$0xf] }
  0xa8   :  { %v1146_v12 = vld [vmem:[%s1856_s7 + $0x1c] sm:$0xf0] }
  0xa9   :  { %v500_v22 = vadd.f32 %v499_v14, %v487_v20  ;;  %v1314_v14 = vld [vmem:[%s1856_s7 + $0x20] sm:$0xf0]  ;;  %v1149_v15 = vor.u32 %v1310_v10, %v1146_v12  ;;  %818 = vmatpush.bf16.msra.mxu2 %v1145_v11  ;;  %v1244_v20 = vld [vmem:[%s1856_s7 + $0xb8] sm:$0xf] }
  0xaa   :  { %v1153_v16 = vor.u32 %v1314_v14, %v1152_v13 }
  0xac   :  { %844 = vmatpush.bf16.msra.mxu0 %v1153_v16 }
  0xae   :  { %v488_v17 = vpop.f32.mrf.mxu2 }
  0xaf   :  { %v501_v18 = vpop.f32.mrf.mxu3  ;;  %v1311_v17 = vld [vmem:[%s1856_s7 + $0xc] sm:$0xf] }
  0xb0   :  { %v1154_v18 = vld [vmem:[%s1856_s7 + $0x24] sm:$0xf0] }
  0xb1   :  { %v1157_v19 = vor.u32 %v1311_v17, %v1154_v18 }
  0xb3   :  { %857 = vmatpush.bf16.msra.mxu1 %v1157_v19 }
  0xb6   :  { %v538_v21 = vpop.f32.mrf.mxu2 }
  0xbe   :  { %v512_v23 = vpop.f32.mrf.mxu0  ;;  %v540_v27 = vpop.f32.mrf.mxu2 }
  0xbf   :  { %v525_v24 = vpop.f32.mrf.mxu1  ;;  %v513_v25 = vadd.f32 %v512_v23, %v500_v22  ;;  %v1333_v22 = vld [vmem:[%s1856_s7 + $0xbc] sm:$0xf] }
  0xc1   :  { %v526_v26 = vadd.f32 %v525_v24, %v513_v25  ;;  %v1246_v24 = vld [vmem:[%s1856_s7 + $0xd4] sm:$0xf0]  ;;  %v1252_v25 = vld [vmem:[%s1856_s7 + $0xc0] sm:$0xf] }
  0xc2   :  { %v1249_v27 = vor.u32 %v1333_v22, %v1246_v24 }
  0xc3   :  { %v539_v28 = vadd.f32 %v538_v21, %v526_v26  ;;  %v1336_v21 = vld [vmem:[%s1856_s7 + $0xd0] sm:$0xf0]  ;;  %v1337_v26 = vld [vmem:[%s1856_s7 + $0xd8] sm:$0xf0] }
  0xc4   :  { %v1245_v23 = vor.u32 %v1336_v21, %v1244_v20 }
  0xc5   :  { %v542_v29 = vmax.f32 %v539_v28, 0.0  ;;  %v1253_v28 = vor.u32 %v1337_v26, %v1252_v25 }
  0xc6   :  { %v514_v30 = vpop.f32.mrf.mxu0  ;;  %867 = vmatpush.bf16.msrb.mxu2 %v1245_v23 }
  0xc7   :  { %v527_v31 = vpop.f32.mrf.mxu1  ;;  %1139 = vmatmul.msk.f32.vlgmr.msrb.gmra.mxu3 %vm555_vm2, %v542_v29  ;;  %v1216_v29 = vld [vmem:[%s1856_s7 + $0x80] sm:$0xf]  ;;  %v1329_v30 = vld [vmem:[%s1856_s7 + $0x98] sm:$0xf0]  ;;  %893 = vmatpush.bf16.msrb.mxu0 %v1253_v28 }
  0xc8   :  { %828 = vmatpush.bf16.msrb.mxu3 %v1233_v40  ;;  %v1326_v31 = vld [vmem:[%s1856_s7 + $0x84] sm:$0xf]  ;;  %v1217_v32 = vor.u32 %v1329_v30, %v1216_v29  ;;  %v1319_v40 = vld [vmem:[%s1856_s7 + $0x4c] sm:$0xf] }
  0xc9   :  { %v1221_v36 = vor.u32 %v1326_v31, %v1218_v33  ;;  %v1193_v45 = vor.u32 %v1319_v40, %v1190_v41 }
  0xca   :  { %868 = vmatpush.bf16.msrb.mxu2 %v1217_v32 }
  0xcb   :  { %894 = vmatpush.bf16.msrb.mxu0 %v1225_v37 }
  0xcc   :  { %829 = vmatpush.bf16.msrb.mxu3 %v1205_v50  ;;  %v1162_v50 = vld [vmem:[%s1856_s7 + $0x2c] sm:$0xf0]  ;;  %s1395_s7 = smov [#allocation2]  }
  0xcd   :  { %v1165_v54 = vor.u32 %v1312_v49, %v1162_v50  ;;  %s915_s6 = sshll.u32 %s1395_s7, 4  ;;  %s916_s6 = int_to_ptr.vmem [resolvable:$true] %s915_s6 }
  0xce   :  { %869 = vmatpush.bf16.msrb.mxu2 %v1189_v44 }
  0xcf   :  { %895 = vmatpush.bf16.msrb.mxu0 %v1197_v46 }
  0xd0   :  { %830 = vmatpush.bf16.msrb.mxu3 %v1177_v2 }
  0xd2   :  { %870 = vmatpush.bf16.msrb.mxu2 %v1161_v53 }
  0xd3   :  { %896 = vmatpush.bf16.msrb.mxu0 %v1169_v55 }
  0xd4   :  { %831 = vmatpush.bf16.msrb.mxu3 %v1149_v15 }
 0x14a   :  { %v576_v61 = vpop.f32.mrf.mxu3 }
 0x14b   :  { %v577_v62 = vadd.f32 %v1341_v60, %v576_v61  ;;  %v648_v61 = vld [vmem:[%s1857_s8] sm:$0x7f]  ;;  %s1396_s8 = smov [#allocation4]  }
 0x14c   :  { %v653_v63 = vperm.slane %v648_v61, 3  ;;  %v650_v4 = vperm.slane %v648_v61, 0  ;;  %v651_v5 = vperm.slane %v648_v61, 1  ;;  %v656_v14 = vperm.slane %v648_v61, 6  ;;  %s926_s9 = sshll.u32 %s1396_s8, 4  ;;  %s927_s9 = int_to_ptr.vmem [resolvable:$true] %s926_s9 }
 0x14d   :  { %1141 = vmatmul.msk.f32.vlgmr.msra.gmra.mxu3 %vm586_vm3, %v577_v62  ;;  %902 = vst.msk [vmem:[#allocation2] sm:$0xff] %vm586_vm3, %v577_v62  ;;  %v652_v62 = vperm.slane %v648_v61, 2  ;;  %v654_v17 = vperm.slane %v648_v61, 4  ;;  %v655_v18 = vperm.slane %v648_v61, 5 }
 0x14e   :  { %880 = vmatpush.bf16.msra.mxu3 %v1249_v27  ;;  %920 = dma.vmem_to_hbm [thread:$0]  %s916_s6, 128, %s918_s17, [#allocation3]  }
 0x152   :  { %881 = vmatpush.bf16.msra.mxu3 %v1221_v36 }
 0x156   :  { %882 = vmatpush.bf16.msra.mxu3 %v1193_v45 }
 0x15a   :  { %883 = vmatpush.bf16.msra.mxu3 %v1165_v54 }
 0x1d0   :  { %v611_v57 = vpop.f32.mrf.mxu3 }
 0x1d1   :  { %v612_v58 = vadd.f32 %v1342_v56, %v611_v57 }
 0x1d3   :  { %v614_v59 = vmax.f32 %v612_v58, 0.0 }
 0x1d5   :  { %v615_v60 = vpack.c.bf16 %v614_v59, %v614_v59 }
 0x1d7   :  { %1254 = vmatmul.msk.bf16.vlgmr.msra.gmra.mxu2 %vm555_vm2, %v615_v60  ;;  %1255 = vmatmul.msk.bf16.vlgmr.msrb.gmra.mxu3 %vm555_vm2, %v615_v60 }
 0x1d8   :  { %1256 = vmatmul.msk.bf16.vlgmr.msra.gmra.mxu0 %vm555_vm2, %v615_v60  ;;  %1257 = vmatmul.msk.bf16.vlgmr.msra.gmra.mxu1 %vm555_vm2, %v615_v60 }
 0x1e7   :  { %1258 = vmatmul.msk.bf16.vlgmr.msrb.gmra.mxu2 %vm555_vm2, %v615_v60  ;;  %1259 = vmatmul.msk.bf16.vlgmr.msra.gmra.mxu3 %vm555_vm2, %v615_v60 }
 0x1e8   :  { %1260 = vmatmul.msk.bf16.vlgmr.msrb.gmra.mxu0 %vm555_vm2, %v615_v60 }
 0x255   :  { %v846_v0 = vpop.f32.mrf.mxu0  ;;  %v859_v1 = vpop.f32.mrf.mxu1 }
 0x256   :  { %v847_v2 = vadd.f32 %v846_v0, %v652_v62  ;;  %v860_v3 = vadd.f32 %v859_v1, %v653_v63 }
 0x258   :  { %905 = vst [vmem:[#allocation4 + $0x10] sm:$0xff] %v847_v2 }
 0x259   :  { %906 = vst [vmem:[#allocation4 + $0x18] sm:$0xff] %v860_v3 }
 0x25a   :  { %v820_v6 = vpop.f32.mrf.mxu2  ;;  %v833_v7 = vpop.f32.mrf.mxu3 }
 0x25b   :  { %v821_v8 = vadd.f32 %v820_v6, %v650_v4  ;;  %v834_v9 = vadd.f32 %v833_v7, %v651_v5 }
 0x25d   :  { %903 = vst [vmem:[#allocation4] sm:$0xff] %v821_v8  ;;  %v848_v10 = vpop.f32.mrf.mxu0  ;;  %v861_v11 = vpop.f32.mrf.mxu1 }
 0x25e   :  { %904 = vst [vmem:[#allocation4 + $0x8] sm:$0xff] %v834_v9 }
 0x262   :  { %v822_v12 = vpop.f32.mrf.mxu2  ;;  %v835_v13 = vpop.f32.mrf.mxu3 }
 0x265   :  { %v898_v15 = vpop.f32.mrf.mxu0 }
 0x266   :  { %v899_v16 = vadd.f32 %v898_v15, %v656_v14 }
 0x268   :  { %909 = vst.msk [vmem:[#allocation4 + $0x30] sm:$0xff] %vm447_vm0, %v899_v16 }
 0x26a   :  { %v872_v19 = vpop.f32.mrf.mxu2  ;;  %v885_v20 = vpop.f32.mrf.mxu3 }
 0x26b   :  { %v873_v21 = vadd.f32 %v872_v19, %v654_v17  ;;  %v886_v22 = vadd.f32 %v885_v20, %v655_v18 }
 0x26d   :  { %907 = vst [vmem:[#allocation4 + $0x20] sm:$0xff] %v873_v21  ;;  %v900_v23 = vpop.f32.mrf.mxu0 }
 0x26e   :  { %908 = vst [vmem:[#allocation4 + $0x28] sm:$0xff] %v886_v22 }
 0x26f   :  { %931 = dma.vmem_to_hbm [thread:$0]  %s927_s9, 896, %s929_s4, [#allocation5]  }
 0x272   :  { %v874_v24 = vpop.f32.mrf.mxu2  ;;  %v887_v25 = vpop.f32.mrf.mxu3 }
 0x273   :  { %1391 = dma.done.wait [#allocation3], 128  }
 0x274   :  { %1392 = vsyncadd [#allocation3], 4294967168 }
 0x275   :  { %1393 = dma.done.wait [#allocation5], 896  }
 0x276   :  { %1394 = vsyncadd [#allocation5], 4294966400 }
 0x277   :  { %940 = vsyncpa [#allocation3], 1 }
 0x278   :  { %941 = vsyncpa [#allocation5], 1 }

</bundles_post_ra>
